<compile_context>
chip_gen: v7x
topology: tpu7x:2x2x1
jax: 0.10.0
libtpu: 0.0.40
codegen_flags: <defaults>
</compile_context>

<pallas_src>
import math

import jax
import jax.numpy as jnp
from jax.experimental import pallas as pl
from jax.experimental.pallas import tpu as pltpu


def _round_up(x, m):
    return ((x + m - 1) // m) * m


# ---------------------------------------------------------------------------
# 1x1 conv on one [Cin, T] tile (channels-first, HW on lanes).
# ---------------------------------------------------------------------------
def _conv1x1_tile(x, w, b, use_vpu):
    """x: [Cin, T] f32, w: [Cout, Cin], b: [Cout, 1] -> [Cout, T] f32."""
    if use_vpu:
        # Tiny Cin: unrolled VPU broadcast MACs (MXU would be ~98% idle).
        cin = x.shape[0]
        acc = w[:, 0:1] * x[0:1, :]
        for i in range(1, cin):
            acc = acc + w[:, i:i + 1] * x[i:i + 1, :]
        return acc + b
    # Real Cin (512-2048): bf16 MXU operands, f32 accumulation.
    return jnp.dot(w.astype(jnp.bfloat16), x.astype(jnp.bfloat16),
                   preferred_element_type=jnp.float32) + b


# ---------------------------------------------------------------------------
# Kernel 1a: per-frame, per-channel sum / sum-of-squares over HW tiles.
# Output blocks [Cout, 1] are revisited across the (arbitrary) HW-tile axis
# and accumulated in VMEM; only a tiny stats vector hits HBM.
# ---------------------------------------------------------------------------
def _make_proj_stats_kernel(hw_tile, hw_valid, hwp, use_vpu):
    needs_mask = hwp != hw_valid

    def kernel(x_ref, w_ref, b_ref, sum_ref, sq_ref):
        t = pl.program_id(1)
        y = _conv1x1_tile(x_ref[...], w_ref[...], b_ref[...], use_vpu)
        if needs_mask:
            lane = jax.lax.broadcasted_iota(jnp.int32, y.shape, 1)
            y = jnp.where(t * hw_tile + lane < hw_valid, y, 0.0)
        s = jnp.sum(y, axis=1, keepdims=True)
        ss = jnp.sum(y * y, axis=1, keepdims=True)

        @pl.when(t == 0)
        def _():
            sum_ref[...] = jnp.zeros_like(sum_ref)
            sq_ref[...] = jnp.zeros_like(sq_ref)

        sum_ref[...] += s
        sq_ref[...] += ss

    return kernel


# ---------------------------------------------------------------------------
# Kernel 1b: re-run the 1x1 conv per HW tile and apply the folded GroupNorm
# affine (scale/shift precomputed per frame & channel).  bf16 store.
# TODO(synk): when Cout*HW fits VMEM, the conv result of pass A could be kept
# in a VMEM scratch to avoid the second x read from HBM.
# ---------------------------------------------------------------------------
def _make_proj_norm_kernel(use_vpu):
    def kernel(x_ref, w_ref, b_ref, scale_ref, shift_ref, o_ref):
        y = _conv1x1_tile(x_ref[...], w_ref[...], b_ref[...], use_vpu)
        o_ref[...] = (y * scale_ref[...] + shift_ref[...]).astype(o_ref.dtype)
    return kernel


def input_proj_groupnorm(x_nchw, w_mat, b_col, gamma, beta, num_groups,
                         out_dtype=jnp.bfloat16):
    """1x1 Conv2d + GroupNorm.  x_nchw: [N, Cin, H, W] -> [N, Cout, H, W]."""
    n, cin, h, w = x_nchw.shape
    cout = w_mat.shape[0]
    hw = h * w
    assert cout % num_groups == 0
    gs = cout // num_groups
    use_vpu = cin <= 8

    # ---- HW (lane) tiling: big lane-dense tiles, capped for v7x VMEM -------
    if hw % 128 != 0 and hw <= 2048:
        hw_tile, hwp = hw, hw                        # single full-extent tile
    else:
        hwp = _round_up(hw, 128)
        if hwp > 2048:
            hw_tile = 2048
            hwp = _round_up(hwp, hw_tile)
        elif hwp >= 256 and (hwp // 2) % 128 == 0:
            hw_tile = hwp // 2                       # >=2 tiles: exercises accum
        else:
            hw_tile = hwp
    nt = hwp // hw_tile

    x_flat = x_nchw.reshape(n, cin, hw)              # f32, no wrapper-side cast
    if hwp != hw:
        x_flat = jnp.pad(x_flat, ((0, 0), (0, 0), (0, hwp - hw)))

    grid = (n, nt)
    x_spec = pl.BlockSpec((pl.Squeezed(), cin, hw_tile), lambda i, t: (i, 0, t))
    w_spec = pl.BlockSpec((cout, cin), lambda i, t: (0, 0))
    b_spec = pl.BlockSpec((cout, 1), lambda i, t: (0, 0))
    col_spec = pl.BlockSpec((pl.Squeezed(), cout, 1), lambda i, t: (i, 0, 0))

    # TODO(synk): on v7x, if DMA is exposed after tiling, bump x/out specs to
    # pipeline_mode=pl.Buffered(3).
    cp_stats = pltpu.CompilerParams(
        dimension_semantics=("parallel", "arbitrary"),
        vmem_limit_bytes=48 * 1024 * 1024)
    cp_norm = pltpu.CompilerParams(
        dimension_semantics=("parallel", "parallel"),
        vmem_limit_bytes=48 * 1024 * 1024)

    # ---- pass A: per-channel sum / sum-sq ----------------------------------
    sum_c, sq_c = pl.pallas_call(
        _make_proj_stats_kernel(hw_tile, hw, hwp, use_vpu),
        out_shape=(jax.ShapeDtypeStruct((n, cout, 1), jnp.float32),
                   jax.ShapeDtypeStruct((n, cout, 1), jnp.float32)),
        grid=grid,
        in_specs=[x_spec, w_spec, b_spec],
        out_specs=(col_spec, col_spec),
        compiler_params=cp_stats,
    )(x_flat, w_mat, b_col)

    # ---- tiny [N, Cout] group stats -> folded scale/shift (plain XLA) ------
    mean_c = sum_c.reshape(n, cout) / hw
    msq_c = sq_c.reshape(n, cout) / hw
    mean_g = mean_c.reshape(n, num_groups, gs).mean(axis=2)
    msq_g = msq_c.reshape(n, num_groups, gs).mean(axis=2)
    var_g = msq_g - mean_g * mean_g
    inv_g = jax.lax.rsqrt(var_g + 1e-5)
    inv_c = jnp.repeat(inv_g, gs, axis=1)            # [n, cout]
    mean_cb = jnp.repeat(mean_g, gs, axis=1)
    scale2d = inv_c * gamma[None, :]
    shift2d = beta[None, :] - mean_cb * scale2d
    scale = scale2d.reshape(n, cout, 1)
    shift = shift2d.reshape(n, cout, 1)

    # ---- pass B: conv + folded affine, bf16 lane-dense store ----------------
    out = pl.pallas_call(
        _make_proj_norm_kernel(use_vpu),
        out_shape=jax.ShapeDtypeStruct((n, cout, hwp), out_dtype),
        grid=grid,
        in_specs=[x_spec, w_spec, b_spec, col_spec, col_spec],
        out_specs=pl.BlockSpec((pl.Squeezed(), cout, hw_tile),
                               lambda i, t: (i, 0, t)),
        compiler_params=cp_norm,
    )(x_flat, w_mat, b_col, scale, shift)

    if hwp != hw:
        out = out[:, :, :hw]
    # TODO(synk): could emit [N, HW, C] directly (and fuse +pos) to kill the
    # downstream transpose once the real transformer consumes it.
    return out.reshape(n, cout, h, w)


# ---------------------------------------------------------------------------
# Kernel 2: detection head, row-tiled over R = L*B*Q.
#   f       = hs @ [wcT_pad | w1T] + [bc | b1]      (one fused MXU pass)
#   logits  = f[:, :128] ; h = relu(f[:, 128:])
#   tmp     = relu(h @ w2T + b2) @ w3T_pad + b3_pad (box cols at [nc, nc+4))
#   tmp    += inverse_sigmoid(reference)            (narrow ref, placed in-kernel)
#   out     = where(box cols, sigmoid(tmp), logits) -- one lane-dense store
# ---------------------------------------------------------------------------
def _make_head_kernel(nc, pad_n, ref_dim):
    def kernel(hs_ref, ref_ref, wf1_ref, bf1_ref, w2_ref, b2_ref,
               w3_ref, b3_ref, out_ref):
        x = hs_ref[...].astype(jnp.bfloat16)                         # [R, C]
        f = jnp.dot(x, wf1_ref[...],
                    preferred_element_type=jnp.float32) + bf1_ref[...]
        logits = f[:, :pad_n]
        h = jnp.maximum(f[:, pad_n:], 0.0)
        h = jnp.maximum(
            jnp.dot(h.astype(jnp.bfloat16), w2_ref[...],
                    preferred_element_type=jnp.float32) + b2_ref[...], 0.0)
        tmp = jnp.dot(h.astype(jnp.bfloat16), w3_ref[...],
                      preferred_element_type=jnp.float32) + b3_ref[...]
        # inverse_sigmoid(reference) on the narrow ref block (EUP logs),
        # added to the first ref_dim box columns.
        r = jnp.clip(ref_ref[...][:, :ref_dim], 0.0, 1.0)
        inv_sig = (jnp.log(jnp.maximum(r, 1e-5))
                   - jnp.log(jnp.maximum(1.0 - r, 1e-5)))
        col = jax.lax.broadcasted_iota(jnp.int32, tmp.shape, 1)
        for d in range(ref_dim):
            tmp = jnp.where(col == nc + d, tmp + inv_sig[:, d:d + 1], tmp)
        boxes = jax.nn.sigmoid(tmp)
        is_box = jnp.logical_and(col >= nc, col < nc + 4)
        out_ref[...] = jnp.where(is_box, boxes, logits)              # lane-dense
    return kernel


def detection_head(hs_flat, ref_flat, consts):
    r, c = hs_flat.shape
    nc, pad_n = consts["nc"], consts["pad_n"]
    ref_dim = ref_flat.shape[-1]          # 2 (no box refine) or 4 (with refine)

    tile_r = 512 if r >= 512 else max(8, _round_up(r, 8))
    rp = _round_up(r, tile_r)

    hs_p = hs_flat if rp == r else jnp.pad(hs_flat, ((0, rp - r), (0, 0)))
    ref_p = jnp.pad(ref_flat, ((0, rp - r), (0, 8 - ref_dim)),
                    constant_values=0.5)

    def row_spec(width):
        return pl.BlockSpec((tile_r, width), lambda i: (i, 0))

    def const_spec(s0, s1):
        return pl.BlockSpec((s0, s1), lambda i: (0, 0))

    out = pl.pallas_call(
        _make_head_kernel(nc, pad_n, ref_dim),
        out_shape=jax.ShapeDtypeStruct((rp, pad_n), jnp.float32),
        grid=(rp // tile_r,),
        in_specs=[
            row_spec(c), row_spec(8),
            const_spec(c, pad_n + c), const_spec(1, pad_n + c),
            const_spec(c, c), const_spec(1, c),
            const_spec(c, pad_n), const_spec(1, pad_n),
        ],
        out_specs=row_spec(pad_n),
        compiler_params=pltpu.CompilerParams(
            dimension_semantics=("parallel",),
            vmem_limit_bytes=32 * 1024 * 1024),
    )(hs_p, ref_p, consts["wf1"], consts["bf1"], consts["w2T"], consts["b2"],
      consts["w3T"], consts["b3"])

    return out[:r, :nc], out[:r, nc:nc + 4]


# ---------------------------------------------------------------------------
# Glue: deterministic stubs + the DeformableDETR forward orchestration.
# ---------------------------------------------------------------------------
def sine_pos_embed(n, c, h, w):
    half = c // 2
    dim_t = 10000.0 ** (2.0 * (jnp.arange(half) // 2) / half)
    y = jnp.arange(1, h + 1, dtype=jnp.float32)[:, None, None] / dim_t
    x = jnp.arange(1, w + 1, dtype=jnp.float32)[None, :, None] / dim_t
    y = jnp.broadcast_to(y, (h, w, half))
    x = jnp.broadcast_to(x, (h, w, half))
    even = (jnp.arange(half) % 2) == 0
    pos_y = jnp.where(even, jnp.sin(y), jnp.cos(y))
    pos_x = jnp.where(even, jnp.sin(x), jnp.cos(x))
    pos = jnp.concatenate([pos_y, pos_x], axis=-1)               # [h, w, c]
    return jnp.broadcast_to(jnp.transpose(pos, (2, 0, 1))[None], (n, c, h, w))


class DeformableDETRPallas:
    def __init__(self, key, hidden_dim=64, num_classes=8, num_queries=16,
                 num_frames=2, num_feature_levels=1, num_dec_layers=3,
                 backbone_channels=4, aux_loss=True):
        assert num_feature_levels == 1
        self.hidden_dim = hidden_dim
        self.num_classes = num_classes
        self.num_queries = num_queries
        self.num_frames = num_frames
        self.num_feature_levels = num_feature_levels
        self.num_dec_layers = num_dec_layers
        self.aux_loss = aux_loss
        self.backbone_channels = backbone_channels

        ks = jax.random.split(key, 10)

        def uni(k, shape, fan_in):
            b = 1.0 / math.sqrt(fan_in)
            return jax.random.uniform(k, shape, jnp.float32, -b, b)

        p = {}
        # input_proj: Conv2d(backbone_channels, hidden_dim, 1) xavier + zero bias
        xb = math.sqrt(6.0 / (backbone_channels + hidden_dim))
        p["proj0_w"] = jax.random.uniform(
            ks[0], (hidden_dim, backbone_channels, 1, 1), jnp.float32, -xb, xb)
        p["proj0_b"] = jnp.zeros((hidden_dim,), jnp.float32)
        p["proj0_gamma"] = jnp.ones((hidden_dim,), jnp.float32)
        p["proj0_beta"] = jnp.zeros((hidden_dim,), jnp.float32)
        # class_embed: Linear(hidden_dim, num_classes), bias = -log((1-p)/p)
        p["wc"] = uni(ks[1], (num_classes, hidden_dim), hidden_dim)
        p["bc"] = jnp.full((num_classes,),
                           -math.log((1 - 0.01) / 0.01), jnp.float32)
        # bbox_embed: MLP(hidden, hidden, 4, 3); last layer zeroed, bias[2:]=-2
        p["w1"] = uni(ks[2], (hidden_dim, hidden_dim), hidden_dim)
        p["b1"] = uni(ks[3], (hidden_dim,), hidden_dim)
        p["w2"] = uni(ks[4], (hidden_dim, hidden_dim), hidden_dim)
        p["b2"] = uni(ks[5], (hidden_dim,), hidden_dim)
        p["w3"] = jnp.zeros((4, hidden_dim), jnp.float32)
        p["b3"] = jnp.array([0.0, 0.0, -2.0, -2.0], jnp.float32)
        # query_embed: Embedding(num_queries, 2*hidden_dim)
        p["query_embed"] = jax.random.normal(
            ks[6], (num_queries, 2 * hidden_dim), jnp.float32)
        # stub parameters (backbone channel projection, reference-point linear)
        p["backbone_proj"] = jax.random.normal(
            ks[7], (backbone_channels, 3), jnp.float32) * 0.1
        p["ref_w"] = jax.random.normal(ks[8], (2, hidden_dim), jnp.float32) * 0.1
        self.params = p

        # ---- hoisted, packed kernel constants (built once, not per forward) -
        self._build_kernel_consts()

    def _build_kernel_consts(self):
        p = self.params
        c = self.hidden_dim
        nc = self.num_classes
        pad_n = _round_up(nc + 4, 128)
        wcT_pad = jnp.zeros((c, pad_n), jnp.float32).at[:, :nc].set(p["wc"].T)
        bc_pad = jnp.zeros((1, pad_n), jnp.float32).at[0, :nc].set(p["bc"])
        # fused [class-head | bbox-MLP layer-1] weights: one MXU pass per tile
        wf1 = jnp.concatenate([wcT_pad, p["w1"].T], axis=1).astype(jnp.bfloat16)
        bf1 = jnp.concatenate([bc_pad, p["b1"].reshape(1, c)], axis=1)
        w3T = jnp.zeros((c, pad_n), jnp.float32).at[:, nc:nc + 4].set(
            p["w3"].T).astype(jnp.bfloat16)
        b3 = jnp.zeros((1, pad_n), jnp.float32).at[0, nc:nc + 4].set(p["b3"])
        self.head_consts = {
            "nc": nc, "pad_n": pad_n,
            "wf1": wf1, "bf1": bf1,
            "w2T": p["w2"].T.astype(jnp.bfloat16), "b2": p["b2"].reshape(1, c),
            "w3T": w3T, "b3": b3,
        }
        cin = self.backbone_channels
        wmat = p["proj0_w"].reshape(c, cin)
        if cin > 8:
            wmat = wmat.astype(jnp.bfloat16)      # MXU-path operand
        self.proj_consts = {
            "w": wmat, "b": p["proj0_b"].reshape(c, 1),
            "gamma": p["proj0_gamma"], "beta": p["proj0_beta"],
        }

    # -- external submodules (stubs) ---------------------------------------
    def backbone_stub(self, x, mask):
        # TODO(synk): real ResNet backbone + joiner position encoding are external
        # modules; replaced by deterministic pooling/projection producing
        # correctly-shaped multi-scale features and sine position embeddings.
        n, c, H, W = x.shape
        pooled2 = x.reshape(n, c, H // 2, 2, W // 2, 2).mean(axis=(3, 5))
        pooled4 = pooled2.reshape(n, c, H // 4, 2, W // 4, 2).mean(axis=(3, 5))
        feat1 = jnp.einsum("nchw,dc->ndhw", pooled4, self.params["backbone_proj"])
        features = [
            (pooled2, jnp.zeros((n, H // 2, W // 2), dtype=bool)),
            (feat1, jnp.zeros((n, H // 4, W // 4), dtype=bool)),
        ]
        pos = [
            sine_pos_embed(n, self.hidden_dim, H // 2, W // 2),
            sine_pos_embed(n, self.hidden_dim, H // 4, W // 4),
        ]
        return features, pos

    def transformer_stub(self, srcs, masks, poses, query_embed):
        # TODO(synk): the deformable transformer (multi-scale deformable attention
        # encoder/decoder) is an external module; replaced by a deterministic
        # surrogate producing correctly-shaped hs / references.
        C = self.hidden_dim
        B = srcs[0].shape[0]
        mem = jnp.concatenate(
            [jnp.transpose((s + p).reshape(B, C, -1), (0, 2, 1))
             for s, p in zip(srcs, poses)], axis=1)               # [B, S, C]
        qpos, tgt = query_embed[:, :C], query_embed[:, C:]
        init_ref = jax.nn.sigmoid(qpos @ self.params["ref_w"].T)  # [Q, 2]
        init_ref = jnp.broadcast_to(init_ref[None], (B, self.num_queries, 2))
        mem_mean = mem.mean(axis=1)                               # [B, C]
        x = jnp.broadcast_to(tgt[None], (B, self.num_queries, C))
        hs, inter = [], []
        for l in range(self.num_dec_layers):
            x = jnp.tanh(x + qpos[None] + (0.1 * (l + 1)) * mem_mean[:, None, :])
            hs.append(x)
            inter.append(jax.nn.sigmoid(x @ self.params["ref_w"].T))
        return (jnp.stack(hs), mem, init_ref, jnp.stack(inter), None, None)

    # -- forward ------------------------------------------------------------
    def forward(self, samples, sample_mask):
        p = self.params
        features, pos = self.backbone_stub(samples, sample_mask)

        srcs, masks, poses = [], [], []
        for l, (feat, feat_mask) in enumerate(features[1:]):
            src_proj_l = input_proj_groupnorm(
                feat, self.proj_consts["w"], self.proj_consts["b"],
                self.proj_consts["gamma"], self.proj_consts["beta"],
                num_groups=32)
            n, c, h, w = src_proj_l.shape
            nf = self.num_frames
            src_proj_l = jnp.transpose(
                src_proj_l.reshape(n // nf, nf, c, h, w), (1, 0, 2, 3, 4))
            fmask = jnp.transpose(
                feat_mask.reshape(n // nf, nf, h, w), (1, 0, 2, 3))
            npp, cp, hp, wp = pos[l + 1].shape
            pos_l = jnp.transpose(
                pos[l + 1].reshape(npp // nf, nf, cp, hp, wp), (1, 0, 2, 3, 4))
            for n_f in range(nf):
                srcs.append(src_proj_l[n_f])
                masks.append(fmask[n_f])
                poses.append(pos_l[n_f])
        # num_feature_levels == len(features) - 1, so no extra pyramid levels.
        # TODO(synk): extra-level branch (F.interpolate + conv stride 2) not exercised.

        query_embeds = p["query_embed"]
        hs, memory, init_reference, inter_references, _, _ = \
            self.transformer_stub(srcs, masks, poses, query_embeds)

        L, B, Q, C = hs.shape
        refs = jnp.stack(
            [init_reference] + [inter_references[l - 1] for l in range(1, L)])

        logits, boxes = detection_head(
            hs.reshape(L * B * Q, C), refs.reshape(L * B * Q, -1),
            self.head_consts)
        outputs_class = logits.reshape(L, B, Q, self.num_classes)
        outputs_coord = boxes.reshape(L, B, Q, 4)

        out = {"pred_logits": outputs_class[-1],
               "pred_boxes": outputs_coord[-1]}
        if self.aux_loss:
            out["aux_outputs"] = [
                {"pred_logits": a, "pred_boxes": b}
                for a, b in zip(outputs_class[:-1], outputs_coord[:-1])]
        return out


if __name__ == "__main__":
    key = jax.random.PRNGKey(0)
    k_model, k_data = jax.random.split(key)

    # hidden_dim=64 -> GroupNorm group_size = 2, exercising the grouped-stats
    # path flagged in the review; 64x64 input -> HW=256, exercising the
    # multi-HW-tile accumulation path of the proj+GN kernels.
    model = DeformableDETRPallas(k_model, hidden_dim=64)

    num_frames, H, W = 2, 64, 64
    samples = jax.random.normal(k_data, (num_frames, 3, H, W), jnp.float32)
    sample_mask = jnp.zeros((num_frames, H, W), dtype=bool)

    out = model.forward(samples, sample_mask)
    jax.block_until_ready(out["pred_logits"])
    jax.block_until_ready(out["pred_boxes"])

    assert out["pred_logits"].shape == (1, 16, 8)
    assert out["pred_boxes"].shape == (1, 16, 4)
    assert len(out["aux_outputs"]) == 2
    assert bool(jnp.all(jnp.isfinite(out["pred_logits"])))
    assert bool(jnp.all((out["pred_boxes"] >= 0.0) & (out["pred_boxes"] <= 1.0)))
    print("KERNEL_OK")
</pallas_src>

<mosaic_0001>
module attributes {stable_mosaic.version = 11 : i64} {
  func.func @kernel(%arg0: i32, %arg1: i32, %arg2: memref<1x4x128xf32, #tpu.memory_space<vmem>>, %arg3: memref<64x4xf32, #tpu.memory_space<vmem>>, %arg4: memref<64x1xf32, #tpu.memory_space<vmem>>, %arg5: memref<1x64x1xf32, #tpu.memory_space<vmem>>, %arg6: memref<1x64x1xf32, #tpu.memory_space<vmem>>) attributes {dimension_semantics = [#tpu.dimension_semantics<parallel>, #tpu.dimension_semantics<arbitrary>], iteration_bounds = array<i64: 2, 2>, scalar_prefetch = 0 : i64, scratch_operands = 0 : i64, tpu.core_type = #tpu.core_type<tc>, window_params = [{transform_indices = @transform_0, window_bounds = array<i64: 1, 4, 128>}, {pipeline_mode = #tpu.pipeline_mode<synchronous>, transform_indices = @transform_1, window_bounds = array<i64: 64, 4>}, {pipeline_mode = #tpu.pipeline_mode<synchronous>, transform_indices = @transform_2, window_bounds = array<i64: 64, 1>}, {transform_indices = @transform_3, window_bounds = array<i64: 1, 64, 1>}, {transform_indices = @transform_4, window_bounds = array<i64: 1, 64, 1>}]} {
    %c0 = arith.constant 0 : index
    %c0_0 = arith.constant 0 : index
    %c0_1 = arith.constant 0 : index
    %0 = vector.load %arg2[%c0, %c0_0, %c0_1] : memref<1x4x128xf32, #tpu.memory_space<vmem>>, vector<1x4x128xf32>
    %1 = vector.shape_cast %0 : vector<1x4x128xf32> to vector<4x128xf32>
    %c0_2 = arith.constant 0 : index
    %c0_3 = arith.constant 0 : index
    %2 = vector.load %arg3[%c0_2, %c0_3] : memref<64x4xf32, #tpu.memory_space<vmem>>, vector<64x4xf32>
    %c0_4 = arith.constant 0 : index
    %c0_5 = arith.constant 0 : index
    %3 = vector.load %arg4[%c0_4, %c0_5] : memref<64x1xf32, #tpu.memory_space<vmem>>, vector<64x1xf32>
    %4 = vector.extract_strided_slice %2 {offsets = [0, 0], sizes = [64, 1], strides = [1, 1]} : vector<64x4xf32> to vector<64x1xf32>
    %5 = vector.extract_strided_slice %1 {offsets = [0, 0], sizes = [1, 128], strides = [1, 1]} : vector<4x128xf32> to vector<1x128xf32>
    %6 = vector.broadcast %4 : vector<64x1xf32> to vector<64x128xf32>
    %7 = vector.broadcast %5 : vector<1x128xf32> to vector<64x128xf32>
    %8 = arith.mulf %6, %7 : vector<64x128xf32>
    %9 = vector.extract_strided_slice %2 {offsets = [0, 1], sizes = [64, 1], strides = [1, 1]} : vector<64x4xf32> to vector<64x1xf32>
    %10 = vector.extract_strided_slice %1 {offsets = [1, 0], sizes = [1, 128], strides = [1, 1]} : vector<4x128xf32> to vector<1x128xf32>
    %11 = vector.broadcast %9 : vector<64x1xf32> to vector<64x128xf32>
    %12 = vector.broadcast %10 : vector<1x128xf32> to vector<64x128xf32>
    %13 = arith.mulf %11, %12 : vector<64x128xf32>
    %14 = arith.addf %8, %13 : vector<64x128xf32>
    %15 = vector.extract_strided_slice %2 {offsets = [0, 2], sizes = [64, 1], strides = [1, 1]} : vector<64x4xf32> to vector<64x1xf32>
    %16 = vector.extract_strided_slice %1 {offsets = [2, 0], sizes = [1, 128], strides = [1, 1]} : vector<4x128xf32> to vector<1x128xf32>
    %17 = vector.broadcast %15 : vector<64x1xf32> to vector<64x128xf32>
    %18 = vector.broadcast %16 : vector<1x128xf32> to vector<64x128xf32>
    %19 = arith.mulf %17, %18 : vector<64x128xf32>
    %20 = arith.addf %14, %19 : vector<64x128xf32>
    %21 = vector.extract_strided_slice %2 {offsets = [0, 3], sizes = [64, 1], strides = [1, 1]} : vector<64x4xf32> to vector<64x1xf32>
    %22 = vector.extract_strided_slice %1 {offsets = [3, 0], sizes = [1, 128], strides = [1, 1]} : vector<4x128xf32> to vector<1x128xf32>
    %23 = vector.broadcast %21 : vector<64x1xf32> to vector<64x128xf32>
    %24 = vector.broadcast %22 : vector<1x128xf32> to vector<64x128xf32>
    %25 = arith.mulf %23, %24 : vector<64x128xf32>
    %26 = arith.addf %20, %25 : vector<64x128xf32>
    %27 = vector.broadcast %3 : vector<64x1xf32> to vector<64x128xf32>
    %28 = arith.addf %26, %27 : vector<64x128xf32>
    %cst = arith.constant dense<0.000000e+00> : vector<64xf32>
    %29 = vector.multi_reduction <add>, %28, %cst [1] : vector<64x128xf32> to vector<64xf32>
    %30 = vector.shape_cast %29 : vector<64xf32> to vector<64x1xf32>
    %31 = arith.mulf %28, %28 : vector<64x128xf32>
    %cst_6 = arith.constant dense<0.000000e+00> : vector<64xf32>
    %32 = vector.multi_reduction <add>, %31, %cst_6 [1] : vector<64x128xf32> to vector<64xf32>
    %33 = vector.shape_cast %32 : vector<64xf32> to vector<64x1xf32>
    %c0_i32 = arith.constant 0 : i32
    %34 = arith.cmpi eq, %arg1, %c0_i32 : i32
    %35 = arith.extui %34 : i1 to i32
    %c0_i32_7 = arith.constant 0 : i32
    %36 = arith.cmpi ne, %35, %c0_i32_7 : i32
    scf.if %36 {
      %cst_20 = arith.constant 0.000000e+00 : f32
      %49 = vector.broadcast %cst_20 : f32 to vector<64x1xf32>
      %c0_21 = arith.constant 0 : index
      %c0_22 = arith.constant 0 : index
      %c0_23 = arith.constant 0 : index
      %50 = vector.load %arg5[%c0_21, %c0_22, %c0_23] : memref<1x64x1xf32, #tpu.memory_space<vmem>>, vector<1x64x1xf32>
      %51 = vector.shape_cast %50 : vector<1x64x1xf32> to vector<64x1xf32>
      %52 = vector.shape_cast %49 : vector<64x1xf32> to vector<1x64x1xf32>
      tpu.vector_store %arg5[%c0_21, %c0_22, %c0_23], %52 {strides = array<i32>} : memref<1x64x1xf32, #tpu.memory_space<vmem>>, vector<1x64x1xf32>,
      %cst_24 = arith.constant 0.000000e+00 : f32
      %53 = vector.broadcast %cst_24 : f32 to vector<64x1xf32>
      %c0_25 = arith.constant 0 : index
      %c0_26 = arith.constant 0 : index
      %c0_27 = arith.constant 0 : index
      %54 = vector.load %arg6[%c0_25, %c0_26, %c0_27] : memref<1x64x1xf32, #tpu.memory_space<vmem>>, vector<1x64x1xf32>
      %55 = vector.shape_cast %54 : vector<1x64x1xf32> to vector<64x1xf32>
      %56 = vector.shape_cast %53 : vector<64x1xf32> to vector<1x64x1xf32>
      tpu.vector_store %arg6[%c0_25, %c0_26, %c0_27], %56 {strides = array<i32>} : memref<1x64x1xf32, #tpu.memory_space<vmem>>, vector<1x64x1xf32>,
    } else {
    }
    %c0_8 = arith.constant 0 : index
    %c0_9 = arith.constant 0 : index
    %c0_10 = arith.constant 0 : index
    %37 = vector.load %arg5[%c0_8, %c0_9, %c0_10] : memref<1x64x1xf32, #tpu.memory_space<vmem>>, vector<1x64x1xf32>
    %38 = vector.shape_cast %37 : vector<1x64x1xf32> to vector<64x1xf32>
    %39 = arith.addf %38, %30 : vector<64x1xf32>
    %c0_11 = arith.constant 0 : index
    %c0_12 = arith.constant 0 : index
    %c0_13 = arith.constant 0 : index
    %40 = vector.load %arg5[%c0_11, %c0_12, %c0_13] : memref<1x64x1xf32, #tpu.memory_space<vmem>>, vector<1x64x1xf32>
    %41 = vector.shape_cast %40 : vector<1x64x1xf32> to vector<64x1xf32>
    %42 = vector.shape_cast %39 : vector<64x1xf32> to vector<1x64x1xf32>
    tpu.vector_store %arg5[%c0_11, %c0_12, %c0_13], %42 {strides = array<i32>} : memref<1x64x1xf32, #tpu.memory_space<vmem>>, vector<1x64x1xf32>,
    %c0_14 = arith.constant 0 : index
    %c0_15 = arith.constant 0 : index
    %c0_16 = arith.constant 0 : index
    %43 = vector.load %arg6[%c0_14, %c0_15, %c0_16] : memref<1x64x1xf32, #tpu.memory_space<vmem>>, vector<1x64x1xf32>
    %44 = vector.shape_cast %43 : vector<1x64x1xf32> to vector<64x1xf32>
    %45 = arith.addf %44, %33 : vector<64x1xf32>
    %c0_17 = arith.constant 0 : index
    %c0_18 = arith.constant 0 : index
    %c0_19 = arith.constant 0 : index
    %46 = vector.load %arg6[%c0_17, %c0_18, %c0_19] : memref<1x64x1xf32, #tpu.memory_space<vmem>>, vector<1x64x1xf32>
    %47 = vector.shape_cast %46 : vector<1x64x1xf32> to vector<64x1xf32>
    %48 = vector.shape_cast %45 : vector<64x1xf32> to vector<1x64x1xf32>
    tpu.vector_store %arg6[%c0_17, %c0_18, %c0_19], %48 {strides = array<i32>} : memref<1x64x1xf32, #tpu.memory_space<vmem>>, vector<1x64x1xf32>,
    return
  }
  func.func @transform_0(%arg0: i32, %arg1: i32) -> (i32, i32, i32) {
    %c0_i32 = arith.constant 0 : i32
    %c0_i32_0 = arith.constant 0 : i32
    return %arg0, %c0_i32, %arg1 : i32, i32, i32
  }
  func.func @transform_1(%arg0: i32, %arg1: i32) -> (i32, i32) {
    %c0_i32 = arith.constant 0 : i32
    %c0_i32_0 = arith.constant 0 : i32
    %c0_i32_1 = arith.constant 0 : i32
    return %c0_i32, %c0_i32_0 : i32, i32
  }
  func.func @transform_2(%arg0: i32, %arg1: i32) -> (i32, i32) {
    %c0_i32 = arith.constant 0 : i32
    %c0_i32_0 = arith.constant 0 : i32
    %c0_i32_1 = arith.constant 0 : i32
    return %c0_i32, %c0_i32_0 : i32, i32
  }
  func.func @transform_3(%arg0: i32, %arg1: i32) -> (i32, i32, i32) {
    %c0_i32 = arith.constant 0 : i32
    %c0_i32_0 = arith.constant 0 : i32
    %c0_i32_1 = arith.constant 0 : i32
    return %arg0, %c0_i32, %c0_i32_0 : i32, i32, i32
  }
  func.func @transform_4(%arg0: i32, %arg1: i32) -> (i32, i32, i32) {
    %c0_i32 = arith.constant 0 : i32
    %c0_i32_0 = arith.constant 0 : i32
    %c0_i32_1 = arith.constant 0 : i32
    return %arg0, %c0_i32, %c0_i32_0 : i32, i32, i32
  }
}

</mosaic_0001>

<bundles_post_ra>
// kernel: tpu_custom_call.1
= control target key start
LH: loop header
LB: loop body
LE: loop exit
PB: predicated region body
PF: predicated region fallthrough
CT: control target
= control target key end

     0   :  { %s862_s15 = smov 0   ;;  %s864_s16 = smov 0   ;;  %s1130_s0 = inlined_call_operand.vmem [shape: f32[2,4,256], index: 0, kind: input, shape index: {}]   ;;  %s1131_s1 = inlined_call_operand.vmem [shape: f32[64,4], index: 1, kind: input, shape index: {}]   ;;  %s1132_s2 = inlined_call_operand.vmem [shape: f32[64,1], index: 2, kind: input, shape index: {}]   ;;  %s1133_s3 = inlined_call_operand.vmem [shape: f32[2,64,1], index: 3, kind: output, shape index: {0}]   ;;  %s1134_s4 = inlined_call_operand.vmem [shape: f32[2,64,1], index: 4, kind: output, shape index: {1}]  }
   0x1   :  { %s866_s17 = smov 0   ;;  %s868_s18 = smov 0  }
   0x2   :  { %s870_s19 = smov 0  }
   0x3 LB: > { %s24_s20 = sadd.s32 1, %s822_s17  ;;  %s27_s21 = sadd.s32 1, %s826_s18  ;;  %s830_s19 = sphi %s870_s19, %s15_s19   ;;  %s826_s18 = sphi %s868_s18, %s1138_s18   ;;  %s822_s17 = sphi %s866_s17, %s1137_s17   ;;  %s818_s16 = sphi %s864_s16, %s1136_s16   ;;  %s814_s15 = sphi %s862_s15, %s1135_s15  }
   0x4   : > { %p25_p0 = scmp.ge.s32.totalorder %s24_s20, 2  ;;  %p726_p1 = scmp.ge.s32.totalorder %s830_s19, 1 }
   0x5   : > { %p182_p2 = scmp.lt.s32.totalorder %s830_s19, 5 }
   0x6   : > { %s1140_s20 = smov (%p25_p0, %s24_s20), 0  ;;  %s1142_s21 = smov (!%p25_p0, %s27_s21), %s826_s18 }
   0x7   : > { %p183_p3 = pnand %p726_p1, %p182_p2  ;;  %p29_p4 = scmp.ge.s32.totalorder %s1142_s21, 2 }
   0x8   : > { %v237_v0 = vld [vmem:[%s1131_s1 + $0x10] sm:$0xff] (!%p183_p3)  ;;  %v235_v1 = vld [vmem:[%s1131_s1] sm:$0xff] (!%p183_p3)  ;;  %v832_v2 = vmov (!%p183_p3), 1   ;;  %v833_v3 = vmov (!%p183_p3), 0   ;;  %p216_p5 = scmp.lt.s32.totalorder (!%p183_p3), %s818_s16, 1  ;;  %v238_v4 = vld [vmem:[%s1131_s1 + $0x18] sm:$0xff] (!%p183_p3)  ;;  %v291_v20 = vlaneseq (!%p183_p3) }
   0x9   : > { %s1144_s21 = smov (%p29_p4, %s1142_s21), 0  ;;  %186 = sbr.rel (%p183_p3) target bundleno = 398 (0x18e), region = 32 }
   0xa   : > { %784 = vset.pattern.permute.xlu0 (!%p183_p3), %v832_v2  ;;  %783 = vset.pattern.permute.xlu1 (!%p183_p3), %v833_v3  ;;  %v240_v5 = vld [vmem:[%s1131_s1 + $0x28] sm:$0xff] (!%p183_p3)  ;;  %v242_v6 = vld [vmem:[%s1131_s1 + $0x38] sm:$0xff] (!%p183_p3)  ;;  %v834_v8 = vmov (!%p183_p3), 2   ;;  %v239_v9 = vld [vmem:[%s1131_s1 + $0x20] sm:$0xff] (!%p183_p3)  ;;  %v835_v11 = vmov (!%p183_p3), 3   ;;  %p218_p6 = scmp.lt.s32.totalorder (!%p183_p3), %s814_s15, 1 }
   0xb   : > { %263 = vperm.xlu1 (!%p183_p3), %783, %v237_v0   ;;  %304 = vperm.xlu0 (!%p183_p3), %784, %v235_v1   ;;  %v236_v7 = vld [vmem:[%s1131_s1 + $0x8] sm:$0xff] (!%p183_p3)  ;;  %v241_v10 = vld [vmem:[%s1131_s1 + $0x30] sm:$0xff] (!%p183_p3)  ;;  %v247_v13 = vld [vmem:[%s1132_s2 + $0x20] sm:$0xff] (!%p183_p3)  ;;  %v292_v21 = vshrl.u32 (!%p183_p3), %v291_v20, 7  ;;  %p733_p7 = scmp.ne.s32.totalorder (!%p183_p3), %s814_s15, 0 }
   0xc   : > { %v244_v12 = vld [vmem:[%s1132_s2 + $0x8] sm:$0xff] (!%p183_p3)  ;;  %v249_v14 = vld [vmem:[%s1132_s2 + $0x30] sm:$0xff] (!%p183_p3)  ;;  %v243_v15 = vld [vmem:[%s1132_s2] sm:$0xff] (!%p183_p3) }
   0xd   : > { %v245_v16 = vld [vmem:[%s1132_s2 + $0x10] sm:$0xff] (!%p183_p3)  ;;  %v246_v17 = vld [vmem:[%s1132_s2 + $0x18] sm:$0xff] (!%p183_p3)  ;;  %v248_v18 = vld [vmem:[%s1132_s2 + $0x28] sm:$0xff] (!%p183_p3)  ;;  %v337_v22 = vsub.s32 (!%p183_p3), 1, %v292_v21  ;;  %v293_v23 = vsub.s32 (!%p183_p3), 0, %v292_v21  ;;  %v389_v60 = vsub.s32 (!%p183_p3), 2, %v292_v21 }
   0xe   : > { %v250_v19 = vld [vmem:[%s1132_s2 + $0x38] sm:$0xff] (!%p183_p3) }
   0xf   : > { %268 = vperm.xlu1 (!%p183_p3), %783, %v238_v4   ;;  %316 = vperm.xlu0 (!%p183_p3), %784, %v238_v4  }
  0x10   : > { %s1146_s16 = smov (!%p216_p5, %s818_s16), 1  ;;  %vm551_vm0 = vcmask (!%p733_p7), 7168  }
  0x11   : > { %s736_s28 = sshll.u32 %s1146_s16, 6  ;;  %s727_s26 = sshll.u32 %s1146_s16, 1 }
  0x12   : > { %s909_s5 = scalar_lea.vmem %s1133_s3, %s736_s28  ;;  %s917_s10 = scalar_lea.vmem %s1134_s4, %s736_s28 }
  0x13   : > { %278 = vperm.xlu1 %783, %v240_v5   ;;  %324 = vperm.xlu0 %784, %v240_v5   ;;  %s219_s25 = scalar_select %p218_p6, %s814_s15, 1 }
  0x15   : > { %s221_s27 = sadd.s32 %s727_s26, %s219_s25 }
  0x16   : > { %s728_s28 = sshll.u32 %s221_s27, 2 }
  0x17   : > { %288 = vperm.xlu1 %783, %v242_v6   ;;  %332 = vperm.xlu0 %784, %v242_v6   ;;  %s223_s6 = scalar_lea.vmem %s1130_s0, %s728_s28 }
  0x18   : > { %v234_v25 = vld [vmem:[%s223_s6] sm:$0xf] }
  0x19   : > { %v963_v27 = vrot.slane %v234_v25, %v337_v22  ;;  %v965_v28 = vrot.slane %v234_v25, %v293_v23 }
  0x1b   : > { %785 = vset.pattern.permute.xlu1 %v832_v2  ;;  %787 = vset.pattern.permute.xlu0 %v834_v8 }
  0x1c   : > { %308 = vperm.xlu1 %785, %v236_v7   ;;  %360 = vperm.xlu0 %787, %v236_v7  }
  0x20   : > { %312 = vperm.xlu1 %785, %v237_v0   ;;  %372 = vperm.xlu0 %787, %v239_v9  }
  0x24   : > { %320 = vperm.xlu1 %785, %v239_v9   ;;  %380 = vperm.xlu0 %787, %v241_v10  }
  0x28   : > { %328 = vperm.xlu1 %785, %v241_v10   ;;  %788 = vset.pattern.permute.xlu0 %v835_v11 }
  0x29   : > { %408 = vperm.xlu0 %788, %v235_v1  }
  0x2c   : > { %786 = vset.pattern.permute.xlu1 %v834_v8 }
  0x2d   : > { %356 = vperm.xlu1 %786, %v235_v1   ;;  %420 = vperm.xlu0 %788, %v238_v4  }
  0x31   : > { %364 = vperm.xlu1 %786, %v237_v0   ;;  %428 = vperm.xlu0 %788, %v240_v5  }
  0x35   : > { %368 = vperm.xlu1 %786, %v238_v4   ;;  %436 = vperm.xlu0 %788, %v242_v6  }
  0x39   : > { %376 = vperm.xlu1 %786, %v240_v5   ;;  %790 = vset.pattern.permute.xlu0 %v833_v3 }
  0x3a   : > { %253 = vperm.xlu0 %790, %v235_v1   ;;  %v441_v1 = vsub.s32 3, %v292_v21 }
  0x3d   : > { %384 = vperm.xlu1 %786, %v242_v6  }
  0x3e   : > { %258 = vperm.xlu0 %790, %v236_v7  }
  0x41   : > { %789 = vset.pattern.permute.xlu1 %v835_v11 }
  0x42   : > { %412 = vperm.xlu1 %789, %v236_v7   ;;  %273 = vperm.xlu0 %790, %v239_v9   ;;  %v992_v7 = vrot.slane %v234_v25, %v441_v1 }
  0x46   : > { %416 = vperm.xlu1 %789, %v237_v0   ;;  %283 = vperm.xlu0 %790, %v241_v10   ;;  %v988_v0 = vrot.slane %v234_v25, %v389_v60 }
  0x4a   : > { %424 = vperm.xlu1 %789, %v239_v9   ;;  %466 = vperm.xlu0 %790, %v244_v12  }
  0x4e   : > { %432 = vperm.xlu1 %789, %v241_v10   ;;  %481 = vperm.xlu0 %790, %v247_v13  }
  0x52   : > { %791 = vset.pattern.permute.xlu1 %v833_v3  ;;  %491 = vperm.xlu0 %790, %v249_v14  }
  0x53   : > { %461 = vperm.xlu1 %791, %v243_v15  }
  0x57   : > { %471 = vperm.xlu1 %791, %v245_v16  }
  0x5b   : > { %476 = vperm.xlu1 %791, %v246_v17  }
  0x5f   : > { %486 = vperm.xlu1 %791, %v248_v18  }
  0x63   : > { %496 = vperm.xlu1 %791, %v250_v19  }
  0x8a   : > { %v961_v24 = vpop.permute.xlu1 %263  ;;  %v305_v26 = vpop.permute.xlu0 %304 }
  0x8b   : > { %v339_v17 = vmul.f32 %v963_v27, %v305_v26 }
  0x8e   : > { %v269_v29 = vpop.permute.xlu1 %268  ;;  %v317_v30 = vpop.permute.xlu0 %316 }
  0x8f   : > { %v298_v31 = vmul.f32 %v965_v28, %v269_v29  ;;  %v342_v32 = vmul.f32 %v963_v27, %v317_v30 }
  0x91   : > { %v969_v33 = vadd.f32 %v342_v32, %v298_v31 }
  0x92   : > { %v279_v34 = vpop.permute.xlu1 %278  ;;  %v325_v35 = vpop.permute.xlu0 %324 }
  0x93   : > { %v300_v36 = vmul.f32 %v965_v28, %v279_v34  ;;  %v344_v37 = vmul.f32 %v963_v27, %v325_v35 }
  0x95   : > { %v973_v38 = vadd.f32 %v344_v37, %v300_v36 }
  0x96   : > { %v289_v39 = vpop.permute.xlu1 %288  ;;  %v333_v40 = vpop.permute.xlu0 %332 }
  0x97   : > { %v302_v41 = vmul.f32 %v965_v28, %v289_v39  ;;  %v346_v42 = vmul.f32 %v963_v27, %v333_v40 }
  0x99   : > { %v977_v43 = vadd.f32 %v346_v42, %v302_v41 }
  0x9b   : > { %v309_v44 = vpop.permute.xlu1 %308  ;;  %v361_v45 = vpop.permute.xlu0 %360 }
  0x9c   : > { %v340_v63 = vmul.f32 %v963_v27, %v309_v44  ;;  %v392_v6 = vmul.f32 %v988_v0, %v361_v45  ;;  %v297_v44 = vmul.f32 %v965_v28, %v961_v24 }
  0x9f   : > { %v313_v46 = vpop.permute.xlu1 %312  ;;  %v373_v47 = vpop.permute.xlu0 %372 }
  0xa0   : > { %v395_v18 = vmul.f32 %v988_v0, %v373_v47  ;;  %v341_v26 = vmul.f32 %v963_v27, %v313_v46 }
  0xa3   : > { %v321_v48 = vpop.permute.xlu1 %320  ;;  %v381_v49 = vpop.permute.xlu0 %380 }
  0xa4   : > { %v343_v9 = vmul.f32 %v963_v27, %v321_v48  ;;  %v397_v34 = vmul.f32 %v988_v0, %v381_v49  ;;  %v349_v49 = vadd.f32 %v341_v26, %v297_v44  ;;  %v836_v26 = vmov (!%p733_p7), 0.0  }
  0xa5   : > { %552 = vst.msk [vmem:[%s909_s5] sm:$0xff] (!%p733_p7), %vm551_vm0, %v836_v26  ;;  %553 = vst.msk [vmem:[%s909_s5 + $0x8] sm:$0xff] (!%p733_p7), %vm551_vm0, %v836_v26 }
  0xa6   : > { %554 = vst.msk [vmem:[%s909_s5 + $0x10] sm:$0xff] (!%p733_p7), %vm551_vm0, %v836_v26  ;;  %555 = vst.msk [vmem:[%s909_s5 + $0x18] sm:$0xff] (!%p733_p7), %vm551_vm0, %v836_v26 }
  0xa7   : > { %v329_v50 = vpop.permute.xlu1 %328  ;;  %556 = vst.msk [vmem:[%s909_s5 + $0x20] sm:$0xff] (!%p733_p7), %vm551_vm0, %v836_v26  ;;  %557 = vst.msk [vmem:[%s909_s5 + $0x28] sm:$0xff] (!%p733_p7), %vm551_vm0, %v836_v26 }
  0xa8   : > { %v409_v51 = vpop.permute.xlu0 %408  ;;  %v345_v19 = vmul.f32 %v963_v27, %v329_v50  ;;  %558 = vst.msk [vmem:[%s909_s5 + $0x30] sm:$0xff] (!%p733_p7), %vm551_vm0, %v836_v26  ;;  %559 = vst.msk [vmem:[%s909_s5 + $0x38] sm:$0xff] (!%p733_p7), %vm551_vm0, %v836_v26 }
  0xa9   : > { %v443_v45 = vmul.f32 %v992_v7, %v409_v51  ;;  %560 = vst.msk [vmem:[%s917_s10] sm:$0xff] (!%p733_p7), %vm551_vm0, %v836_v26  ;;  %561 = vst.msk [vmem:[%s917_s10 + $0x8] sm:$0xff] (!%p733_p7), %vm551_vm0, %v836_v26 }
  0xaa   : > { %562 = vst.msk [vmem:[%s917_s10 + $0x10] sm:$0xff] (!%p733_p7), %vm551_vm0, %v836_v26  ;;  %563 = vst.msk [vmem:[%s917_s10 + $0x18] sm:$0xff] (!%p733_p7), %vm551_vm0, %v836_v26 }
  0xab   : > { %564 = vst.msk [vmem:[%s917_s10 + $0x20] sm:$0xff] (!%p733_p7), %vm551_vm0, %v836_v26  ;;  %565 = vst.msk [vmem:[%s917_s10 + $0x28] sm:$0xff] (!%p733_p7), %vm551_vm0, %v836_v26 }
  0xac   : > { %v357_v52 = vpop.permute.xlu1 %356  ;;  %v979_v53 = vpop.permute.xlu0 %420  ;;  %566 = vst.msk [vmem:[%s917_s10 + $0x30] sm:$0xff] (!%p733_p7), %vm551_vm0, %v836_v26  ;;  %567 = vst.msk [vmem:[%s917_s10 + $0x38] sm:$0xff] (!%p733_p7), %vm551_vm0, %v836_v26 }
  0xad   : > { %v391_v32 = vmul.f32 %v988_v0, %v357_v52  ;;  %v446_v24 = vmul.f32 %v992_v7, %v979_v53 }
  0xb0   : > { %v365_v54 = vpop.permute.xlu1 %364  ;;  %v981_v55 = vpop.permute.xlu0 %428 }
  0xb1   : > { %v393_v47 = vmul.f32 %v988_v0, %v365_v54 }
  0xb4   : > { %v369_v56 = vpop.permute.xlu1 %368  ;;  %v983_v57 = vpop.permute.xlu0 %436 }
  0xb5   : > { %v394_v50 = vmul.f32 %v988_v0, %v369_v56 }
  0xb8   : > { %v377_v58 = vpop.permute.xlu1 %376 }
  0xb9   : > { %v254_v59 = vpop.permute.xlu0 %253  ;;  %v396_v51 = vmul.f32 %v988_v0, %v377_v58 }
  0xba   : > { %v295_v12 = vmul.f32 %v965_v28, %v254_v59 }
  0xbc   : > { %v985_v61 = vpop.permute.xlu1 %384  ;;  %v347_v21 = vadd.f32 %v339_v17, %v295_v12 }
  0xbd   : > { %v259_v62 = vpop.permute.xlu0 %258 }
  0xbe   : > { %v296_v2 = vmul.f32 %v965_v28, %v259_v62  ;;  %v399_v39 = vadd.f32 %v391_v32, %v347_v21  ;;  %v401_v62 = vadd.f32 %v393_v47, %v349_v49 }
  0xc0   : > { %v348_v3 = vadd.f32 %v340_v63, %v296_v2  ;;  %v451_v52 = vadd.f32 %v443_v45, %v399_v39 }
  0xc1   : > { %v413_v4 = vpop.permute.xlu1 %412  ;;  %v274_v5 = vpop.permute.xlu0 %273 }
  0xc2   : > { %v299_v8 = vmul.f32 %v965_v28, %v274_v5  ;;  %v444_v10 = vmul.f32 %v992_v7, %v413_v4  ;;  %v400_v11 = vadd.f32 %v392_v6, %v348_v3  ;;  %v448_v3 = vmul.f32 %v992_v7, %v981_v55 }
  0xc3   : > { %v404_v4 = vadd.f32 %v396_v51, %v973_v38  ;;  %v398_v5 = vmul.f32 %v988_v0, %v985_v61  ;;  %v450_v55 = vmul.f32 %v992_v7, %v983_v57 }
  0xc4   : > { %v351_v15 = vadd.f32 %v343_v9, %v299_v8  ;;  %v452_v20 = vadd.f32 %v444_v10, %v400_v11 }
  0xc5   : > { %v417_v13 = vpop.permute.xlu1 %416  ;;  %v284_v14 = vpop.permute.xlu0 %283  ;;  %v406_v58 = vadd.f32 %v398_v5, %v977_v43  ;;  %v456_v9 = vadd.f32 %v448_v3, %v404_v4 }
  0xc6   : > { %v301_v16 = vmul.f32 %v965_v28, %v284_v14  ;;  %v403_v31 = vadd.f32 %v395_v18, %v351_v15  ;;  %v445_v27 = vmul.f32 %v992_v7, %v417_v13  ;;  %v402_v28 = vadd.f32 %v394_v50, %v969_v33 }
  0xc7   : > { %v458_v38 = vadd.f32 %v450_v55, %v406_v58 }
  0xc8   : > { %v353_v25 = vadd.f32 %v345_v19, %v301_v16  ;;  %v453_v54 = vadd.f32 %v445_v27, %v401_v62  ;;  %v454_v53 = vadd.f32 %v446_v24, %v402_v28 }
  0xc9   : > { %v425_v22 = vpop.permute.xlu1 %424  ;;  %v467_v23 = vpop.permute.xlu0 %466 }
  0xca   : > { %v447_v29 = vmul.f32 %v992_v7, %v425_v22  ;;  %v500_v30 = vadd.f32 %v467_v23, %v452_v20  ;;  %v405_v42 = vadd.f32 %v397_v34, %v353_v25 }
  0xcc   : > { %509 = vadd.xlane.f32.xlu1 %v500_v30  ;;  %v455_v35 = vadd.f32 %v447_v29, %v403_v31  ;;  %v524_v14 = vmul.f32 %v500_v30, %v500_v30 }
  0xcd   : > { %v433_v36 = vpop.permute.xlu1 %432  ;;  %v482_v37 = vpop.permute.xlu0 %481 }
  0xce   : > { %v449_v40 = vmul.f32 %v992_v7, %v433_v36  ;;  %v503_v41 = vadd.f32 %v482_v37, %v455_v35 }
  0xd0   : > { %515 = vadd.xlane.f32.xlu1 %v503_v41  ;;  %v457_v48 = vadd.f32 %v449_v40, %v405_v42  ;;  %v527_v11 = vmul.f32 %v503_v41, %v503_v41 }
  0xd1   : > { %v492_v46 = vpop.permute.xlu0 %491 }
  0xd2   : > { %v505_v59 = vadd.f32 %v492_v46, %v457_v48  ;;  %v462_v60 = vpop.permute.xlu1 %461 }
  0xd3   : > { %v499_v63 = vadd.f32 %v462_v60, %v451_v52 }
  0xd4   : > { %519 = vadd.xlane.f32.xlu1 %v505_v59  ;;  %v529_v0 = vmul.f32 %v505_v59, %v505_v59 }
  0xd5   : > { %507 = vadd.xlane.f32.xlu0 %v499_v63  ;;  %v523_v1 = vmul.f32 %v499_v63, %v499_v63 }
  0xd6   : > { %v472_v56 = vpop.permute.xlu1 %471 }
  0xd7   : > { %v501_v2 = vadd.f32 %v472_v56, %v453_v54 }
  0xd8   : > { %531 = vadd.xlane.f32.xlu1 %v523_v1 }
  0xd9   : > { %511 = vadd.xlane.f32.xlu0 %v501_v2  ;;  %v525_v6 = vmul.f32 %v501_v2, %v501_v2 }
  0xda   : > { %v477_v33 = vpop.permute.xlu1 %476 }
  0xdb   : > { %v502_v8 = vadd.f32 %v477_v33, %v454_v53 }
  0xdc   : > { %535 = vadd.xlane.f32.xlu1 %v525_v6 }
  0xdd   : > { %513 = vadd.xlane.f32.xlu0 %v502_v8  ;;  %v526_v15 = vmul.f32 %v502_v8, %v502_v8 }
  0xde   : > { %v487_v10 = vpop.permute.xlu1 %486 }
  0xdf   : > { %v504_v12 = vadd.f32 %v487_v10, %v456_v9 }
  0xe0   : > { %539 = vadd.xlane.f32.xlu1 %v527_v11 }
  0xe1   : > { %517 = vadd.xlane.f32.xlu0 %v504_v12  ;;  %v528_v43 = vmul.f32 %v504_v12, %v504_v12 }
  0xe2   : > { %v497_v61 = vpop.permute.xlu1 %496 }
  0xe3   : > { %v506_v13 = vadd.f32 %v497_v61, %v458_v38 }
  0xe4   : > { %543 = vadd.xlane.f32.xlu1 %v529_v0 }
  0xe5   : > { %521 = vadd.xlane.f32.xlu0 %v506_v13  ;;  %v530_v16 = vmul.f32 %v506_v13, %v506_v13 }
  0xe9   : > { %533 = vadd.xlane.f32.xlu0 %v524_v14 }
  0xed   : > { %537 = vadd.xlane.f32.xlu0 %v526_v15 }
  0xf1   : > { %541 = vadd.xlane.f32.xlu0 %v528_v43 }
  0xf5   : > { %545 = vadd.xlane.f32.xlu0 %v530_v16 }
 0x159   : > { %v510_v17 = vpop.xlane.xlu1 %509 }
 0x15d   : > { %v516_v18 = vpop.xlane.xlu1 %515 }
 0x161   : > { %v520_v57 = vpop.xlane.xlu1 %519 }
 0x162   : > { %v508_v7 = vpop.xlane.xlu0 %507 }
 0x165   : > { %v532_v19 = vpop.xlane.xlu1 %531 }
 0x166   : > { %v512_v20 = vpop.xlane.xlu0 %511 }
 0x169   : > { %v536_v21 = vpop.xlane.xlu1 %535 }
 0x16a   : > { %v514_v22 = vpop.xlane.xlu0 %513 }
 0x16d   : > { %v1025_v23 = vpop.xlane.xlu1 %539 }
 0x16e   : > { %v518_v25 = vpop.xlane.xlu0 %517 }
 0x171   : > { %v1027_v29 = vpop.xlane.xlu1 %543 }
 0x172   : > { %v522_v30 = vpop.xlane.xlu0 %521 }
 0x176   : > { %v534_v31 = vpop.xlane.xlu0 %533 }
 0x17a   : > { %v538_v32 = vpop.xlane.xlu0 %537 }
 0x17c   : > { %550 = sbr.rel (%p733_p7) target bundleno = 387 (0x183), region = 36 }
 0x17e   : > { %v542_v34 = vpop.xlane.xlu0 %541 }
 0x182   : > { %v1029_v35 = vpop.xlane.xlu0 %545 }
 0x183 PF: > { %v568_v36 = vld [vmem:[%s909_s5] sm:$0xff]  ;;  %vm584_vm1 = vcmask 7168   ;;  %v569_v37 = vld [vmem:[%s909_s5 + $0x8] sm:$0xff]  ;;  %v570_v39 = vld [vmem:[%s909_s5 + $0x10] sm:$0xff] }
 0x184   : > { %v576_v40 = vadd.f32 %v568_v36, %v508_v7  ;;  %v577_v41 = vadd.f32 %v569_v37, %v510_v17  ;;  %v578_v42 = vadd.f32 %v570_v39, %v512_v20  ;;  %v571_v44 = vld [vmem:[%s909_s5 + $0x18] sm:$0xff]  ;;  %v572_v45 = vld [vmem:[%s909_s5 + $0x20] sm:$0xff]  ;;  %v573_v47 = vld [vmem:[%s909_s5 + $0x28] sm:$0xff] }
 0x185   : > { %v579_v48 = vadd.f32 %v571_v44, %v514_v22  ;;  %v580_v49 = vadd.f32 %v572_v45, %v516_v18  ;;  %v581_v50 = vadd.f32 %v573_v47, %v518_v25  ;;  %v574_v27 = vld [vmem:[%s909_s5 + $0x30] sm:$0xff]  ;;  %v575_v46 = vld [vmem:[%s909_s5 + $0x38] sm:$0xff]  ;;  %v593_v52 = vld [vmem:[%s917_s10] sm:$0xff] }
 0x186   : > { %585 = vst.msk [vmem:[%s909_s5] sm:$0xff] %vm584_vm1, %v576_v40  ;;  %586 = vst.msk [vmem:[%s909_s5 + $0x8] sm:$0xff] %vm584_vm1, %v577_v41  ;;  %v582_v59 = vadd.f32 %v574_v27, %v520_v57  ;;  %v583_v60 = vadd.f32 %v575_v46, %v522_v30  ;;  %v601_v62 = vadd.f32 %v593_v52, %v532_v19  ;;  %v594_v63 = vld [vmem:[%s917_s10 + $0x8] sm:$0xff]  ;;  %v595_v24 = vld [vmem:[%s917_s10 + $0x10] sm:$0xff] }
 0x187   : > { %587 = vst.msk [vmem:[%s909_s5 + $0x10] sm:$0xff] %vm584_vm1, %v578_v42  ;;  %v596_v28 = vld [vmem:[%s917_s10 + $0x18] sm:$0xff]  ;;  %588 = vst.msk [vmem:[%s909_s5 + $0x18] sm:$0xff] %vm584_vm1, %v579_v48  ;;  %v602_v51 = vadd.f32 %v594_v63, %v534_v31  ;;  %v603_v54 = vadd.f32 %v595_v24, %v536_v21  ;;  %v597_v56 = vld [vmem:[%s917_s10 + $0x20] sm:$0xff] }
 0x188   : > { %589 = vst.msk [vmem:[%s909_s5 + $0x20] sm:$0xff] %vm584_vm1, %v580_v49  ;;  %590 = vst.msk [vmem:[%s909_s5 + $0x28] sm:$0xff] %vm584_vm1, %v581_v50  ;;  %v604_v1 = vadd.f32 %v596_v28, %v538_v32  ;;  %v598_v2 = vld [vmem:[%s917_s10 + $0x28] sm:$0xff]  ;;  %v599_v3 = vld [vmem:[%s917_s10 + $0x30] sm:$0xff]  ;;  %v605_v4 = vadd.f32 %v597_v56, %v1025_v23 }
 0x189   : > { %591 = vst.msk [vmem:[%s909_s5 + $0x30] sm:$0xff] %vm584_vm1, %v582_v59  ;;  %592 = vst.msk [vmem:[%s909_s5 + $0x38] sm:$0xff] %vm584_vm1, %v583_v60  ;;  %v606_v5 = vadd.f32 %v598_v2, %v542_v34  ;;  %v607_v53 = vadd.f32 %v599_v3, %v1027_v29  ;;  %v600_v6 = vld [vmem:[%s917_s10 + $0x38] sm:$0xff] }
 0x18a   : > { %609 = vst.msk [vmem:[%s917_s10] sm:$0xff] %vm584_vm1, %v601_v62  ;;  %610 = vst.msk [vmem:[%s917_s10 + $0x8] sm:$0xff] %vm584_vm1, %v602_v51  ;;  %v608_v33 = vadd.f32 %v600_v6, %v1029_v35 }
 0x18b   : > { %611 = vst.msk [vmem:[%s917_s10 + $0x10] sm:$0xff] %vm584_vm1, %v603_v54  ;;  %612 = vst.msk [vmem:[%s917_s10 + $0x18] sm:$0xff] %vm584_vm1, %v604_v1 }
 0x18c   : > { %613 = vst.msk [vmem:[%s917_s10 + $0x20] sm:$0xff] %vm584_vm1, %v605_v4  ;;  %614 = vst.msk [vmem:[%s917_s10 + $0x28] sm:$0xff] %vm584_vm1, %v606_v5 }
 0x18d   : > { %615 = vst.msk [vmem:[%s917_s10 + $0x30] sm:$0xff] %vm584_vm1, %v607_v53  ;;  %616 = vst.msk [vmem:[%s917_s10 + $0x38] sm:$0xff] %vm584_vm1, %v608_v33 }
 0x18e PF: > { %s15_s19 = sadd.s32 1, %s830_s19   ;;  %s1135_s15 = smov %s822_s17 }
 0x18f   : > { %p12_p8 = scmp.ge.s32.totalorder %s15_s19, 6   ;;  %s1136_s16 = smov %s826_s18 }
 0x190   : > { %s1137_s17 = smov %s1140_s20  ;;  %s1138_s18 = smov %s1144_s21 }
 0x191   :  { %14 = sbr.rel (!%p12_p8) target bundleno = 3 (0x3), region = 78 }

</bundles_post_ra>
